<compile_context>
chip_gen: v5e
topology: v5e:2x2
jax: 0.10.0
libtpu: 0.0.40
codegen_flags: <defaults>
</compile_context>

<pallas_src>
import jax
import jax.numpy as jnp
from jax.experimental import pallas as pl
from jax.experimental.pallas import tpu as pltpu


def fused_linear_kernel(x_ref, w_ref, b_ref, o_ref):
    # Single MXU matmul over the pre-concatenated shard weight (both shard
    # matmuls fused), plus one VPU bias add (bias = b1 + b2, folded at
    # prepare time).  f32 accumulation on the MXU.
    o_ref[...] = (
        jnp.dot(x_ref[...], w_ref[...], preferred_element_type=jnp.float32)
        + b_ref[...]
    )


def prepare_params(w1, b1, w2, b2):
    """One-time parameter prep (call at init, NOT per forward).

    Folds:
      * the PyTorch (N, K) -> (K, N) transposes,
      * the shard concat  W_cat = [w1^T ; w2^T]  -> (2K, N),
      * the bias sum      b     = b1 + b2        -> (1, N),
    so the per-call kernel is a single dense matmul with 3 small DMA'd inputs.
    No lane padding: the (B, N) output is written directly by the kernel.
    """
    assert w1.shape == w2.shape, f"shard weight shape mismatch: {w1.shape} vs {w2.shape}"
    assert b1.shape == b2.shape == (w1.shape[0],), "shard bias shape mismatch"
    w_cat = jnp.concatenate([w1.T, w2.T], axis=0).astype(jnp.float32)   # (2K, N)
    b_sum = (b1 + b2).astype(jnp.float32).reshape(1, -1)                # (1, N)
    return w_cat, b_sum


def model_forward(x, w_cat, b_sum):
    """x: (B, 2K) f32; w_cat: (2K, N) f32; b_sum: (1, N) f32 -> (B, N) f32."""
    B = x.shape[0]
    N = w_cat.shape[1]
    # No grid: single-shot kernel, whole arrays resident in VMEM — avoids the
    # 1-point-grid pipeline setup overhead that dominated this tiny kernel.
    # TODO(synk): if batch grows, grid over the batch dim with a row-tile
    # multiple of 8, constant W/bias index_maps, and dimension_semantics
    # ("parallel",) to use both v7x TensorCores.
    return pl.pallas_call(
        fused_linear_kernel,
        out_shape=jax.ShapeDtypeStruct((B, N), jnp.float32),
        in_specs=[
            pl.BlockSpec(memory_space=pltpu.MemorySpace.VMEM),  # x     (B, 2K)
            pl.BlockSpec(memory_space=pltpu.MemorySpace.VMEM),  # W_cat (2K, N)
            pl.BlockSpec(memory_space=pltpu.MemorySpace.VMEM),  # bias  (1, N)
        ],
        out_specs=pl.BlockSpec(memory_space=pltpu.MemorySpace.VMEM),
    )(x, w_cat, b_sum)


if __name__ == "__main__":
    B, K, N = 8, 100, 10  # batch, per-shard in_features, out_features

    key = jax.random.PRNGKey(0)
    kx, kw1, kb1, kw2, kb2 = jax.random.split(key, 5)

    # Deterministic parameter init (uniform, PyTorch-Linear-like 1/sqrt(fan_in)).
    scale = 1.0 / jnp.sqrt(jnp.float32(K))
    x = jax.random.normal(kx, (B, 2 * K), dtype=jnp.float32)
    w1 = jax.random.uniform(kw1, (N, K), jnp.float32, -scale, scale)
    b1 = jax.random.uniform(kb1, (N,), jnp.float32, -scale, scale)
    w2 = jax.random.uniform(kw2, (N, K), jnp.float32, -scale, scale)
    b2 = jax.random.uniform(kb2, (N,), jnp.float32, -scale, scale)

    # One-time parameter preparation, hoisted out of the per-call hot path.
    w_cat, b_sum = prepare_params(w1, b1, w2, b2)

    fwd = jax.jit(model_forward)
    out = jax.block_until_ready(fwd(x, w_cat, b_sum))

    # Pure-JAX reference of the same row-parallel forward.
    x1, x2 = jnp.split(x, 2, axis=1)
    ref = (x1 @ w1.T + b1) + (x2 @ w2.T + b2)

    assert out.shape == (B, N)
    assert jnp.allclose(out, ref, atol=1e-5, rtol=1e-5)
    print("KERNEL_OK")
</pallas_src>

<mosaic_0001>
module attributes {stable_mosaic.version = 11 : i64} {
  func.func @fused_linear_kernel(%arg0: memref<8x200xf32, #tpu.memory_space<vmem>>, %arg1: memref<200x10xf32, #tpu.memory_space<vmem>>, %arg2: memref<1x10xf32, #tpu.memory_space<vmem>>, %arg3: memref<8x10xf32, #tpu.memory_space<vmem>>) attributes {dimension_semantics = [], scalar_prefetch = 0 : i64, scratch_operands = 0 : i64, tpu.core_type = #tpu.core_type<tc>} {
    %c0 = arith.constant 0 : index
    %c0_0 = arith.constant 0 : index
    %0 = vector.load %arg0[%c0, %c0_0] : memref<8x200xf32, #tpu.memory_space<vmem>>, vector<8x200xf32>
    %c0_1 = arith.constant 0 : index
    %c0_2 = arith.constant 0 : index
    %1 = vector.load %arg1[%c0_1, %c0_2] : memref<200x10xf32, #tpu.memory_space<vmem>>, vector<200x10xf32>
    %cst = arith.constant dense<0.000000e+00> : vector<8x10xf32>
    %2 = tpu.matmul %0, %1, %cst {dimension_numbers = #tpu.dot_dimension_numbers<[1], [0], [0], [1], [0, 0, 1, 1], [], []>} : vector<8x200xf32>, vector<200x10xf32>, vector<8x10xf32> -> vector<8x10xf32>
    %c0_3 = arith.constant 0 : index
    %c0_4 = arith.constant 0 : index
    %3 = vector.load %arg2[%c0_3, %c0_4] : memref<1x10xf32, #tpu.memory_space<vmem>>, vector<1x10xf32>
    %4 = vector.broadcast %3 : vector<1x10xf32> to vector<8x10xf32>
    %5 = arith.addf %2, %4 : vector<8x10xf32>
    %c0_5 = arith.constant 0 : index
    %c0_6 = arith.constant 0 : index
    %6 = vector.load %arg3[%c0_5, %c0_6] : memref<8x10xf32, #tpu.memory_space<vmem>>, vector<8x10xf32>
    tpu.vector_store %arg3[%c0_5, %c0_6], %5 {strides = array<i32>} : memref<8x10xf32, #tpu.memory_space<vmem>>, vector<8x10xf32>,
    return
  }
}

</mosaic_0001>

<bundles_post_ra>
// kernel: model_forward.1
= control target key start
LH: loop header
LB: loop body
LE: loop exit
PB: predicated region body
PF: predicated region fallthrough
CT: control target
= control target key end

     0   :  { %s245_s0 = inlined_call_operand.vmem [shape: f32[8,200], index: 0, kind: input, shape index: {}]   ;;  %s246_s1 = inlined_call_operand.vmem [shape: f32[200,10], index: 1, kind: input, shape index: {}]   ;;  %s247_s2 = inlined_call_operand.vmem [shape: f32[1,10], index: 2, kind: input, shape index: {}]   ;;  %s248_s3 = inlined_call_operand.hbm [shape: f32[8,10], index: 3, kind: output, shape index: {}]  }
   0x1   :  { %v32_v0 = vld [vmem:[%s246_s1 + $0x78] sm:$0xff]  ;;  %v31_v1 = vld [vmem:[%s246_s1 + $0x70] sm:$0xff]  ;;  %v30_v2 = vld [vmem:[%s246_s1 + $0x68] sm:$0xff] }
   0x2   :  { %50 = vmatpush.msra.mxu0 %v32_v0  ;;  %v41_v3 = vld [vmem:[%s246_s1 + $0xc0] sm:$0xff]  ;;  %v40_v4 = vld [vmem:[%s246_s1 + $0xb8] sm:$0xff]  ;;  %v39_v6 = vld [vmem:[%s246_s1 + $0xb0] sm:$0xff] }
   0x3   :  { %v29_v5 = vld [vmem:[%s246_s1 + $0x60] sm:$0xff]  ;;  %77 = vmatpush.msra.mxu1 %v41_v3  ;;  %v28_v7 = vld [vmem:[%s246_s1 + $0x58] sm:$0xff]  ;;  %v38_v8 = vld [vmem:[%s246_s1 + $0xa8] sm:$0xff] }
   0x4   :  { %51 = vmatpush.msra.mxu0 %v31_v1  ;;  %v27_v9 = vld [vmem:[%s246_s1 + $0x50] sm:$0xff]  ;;  %v37_v10 = vld [vmem:[%s246_s1 + $0xa0] sm:$0xff] }
   0x5   :  { %78 = vmatpush.msra.mxu1 %v40_v4 }
   0x6   :  { %52 = vmatpush.msra.mxu0 %v30_v2 }
   0x7   :  { %79 = vmatpush.msra.mxu1 %v39_v6 }
   0x8   :  { %53 = vmatpush.msra.mxu0 %v29_v5 }
   0xa   :  { %54 = vmatpush.msra.mxu0 %v28_v7 }
   0xb   :  { %8 = vsyncpa [#allocation3], 0  ;;  %v26_v11 = vld [vmem:[%s246_s1 + $0x48] sm:$0xff]  ;;  %80 = vmatpush.msra.mxu1 %v38_v8  ;;  %v36_v12 = vld [vmem:[%s246_s1 + $0x98] sm:$0xff]  ;;  %vm46_vm0 = vcmask 588800   ;;  %s137_s14 = smov [#allocation2]  }
   0xc   :  { %55 = vmatpush.msra.mxu0 %v27_v9  ;;  %v25_v13 = vld [vmem:[%s246_s1 + $0x40] sm:$0xff]  ;;  %v35_v14 = vld [vmem:[%s246_s1 + $0x90] sm:$0xff]  ;;  %v24_v15 = vld [vmem:[%s246_s1 + $0x38] sm:$0xff]  ;;  %s97_s15 = sshll.u32 %s137_s14, 4  ;;  %s99_s18 = sshll.u32 %s248_s3, 4  ;;  %vm90_vm1 = vcmask 80896   ;;  %s98_s15 = int_to_ptr.vmem [resolvable:$true] %s97_s15  ;;  %s100_s18 = int_to_ptr.hbm [resolvable:$true] %s99_s18 }
   0xd   :  { %81 = vmatpush.msra.mxu1 %v37_v10  ;;  %v34_v16 = vld [vmem:[%s246_s1 + $0x88] sm:$0xff]  ;;  %v23_v17 = vld [vmem:[%s246_s1 + $0x30] sm:$0xff]  ;;  %v33_v18 = vld [vmem:[%s246_s1 + $0x80] sm:$0xff] }
   0xe   :  { %56 = vmatpush.msra.mxu0 %v26_v11  ;;  %v22_v19 = vld [vmem:[%s246_s1 + $0x28] sm:$0xff]  ;;  %v21_v21 = vld [vmem:[%s246_s1 + $0x20] sm:$0xff]  ;;  %v20_v22 = vld [vmem:[%s246_s1 + $0x18] sm:$0xff] }
   0xf   :  { %82 = vmatpush.msra.mxu1 %v36_v12  ;;  %v16_v20 = vld [vmem:[%s245_s0 + $0x8] sm:$0xff]  ;;  %v19_v23 = vld [vmem:[%s246_s1 + $0x10] sm:$0xff]  ;;  %v17_v25 = vld [vmem:[%s246_s1] sm:$0xff] }
  0x10   :  { %57 = vmatpush.msra.mxu0 %v25_v13  ;;  %v18_v24 = vld [vmem:[%s246_s1 + $0x8] sm:$0xff]  ;;  %v15_v26 = vld [vmem:[%s245_s0] sm:$0xff] }
  0x11   :  { %83 = vmatpush.msra.mxu1 %v35_v14  ;;  %v110_v27 = vld [vmem:[%s247_s2] ss:$0 sm:$0xff] }
  0x12   :  { %58 = vmatpush.msra.mxu0 %v24_v15 }
  0x13   :  { %84 = vmatpush.msra.mxu1 %v34_v16 }
  0x14   :  { %59 = vmatpush.msra.mxu0 %v23_v17 }
  0x15   :  { %85 = vmatpush.msra.mxu1 %v33_v18 }
  0x16   :  { %60 = vmatpush.msra.mxu0 %v22_v19  ;;  %108 = vmatmul.msk.f32.vlgmr.msra.gmra.mxu1 %vm46_vm0, %v16_v20 }
  0x18   :  { %61 = vmatpush.msra.mxu0 %v21_v21 }
  0x1a   :  { %62 = vmatpush.msra.mxu0 %v20_v22 }
  0x1c   :  { %63 = vmatpush.msra.mxu0 %v19_v23 }
  0x1e   :  { %64 = vmatpush.msra.mxu0 %v18_v24 }
  0x20   :  { %65 = vmatpush.msra.mxu0 %v17_v25 }
  0x21   :  { %66 = vmatmul.f32.vlgmr.msra.gmra.mxu0 %v15_v26 }
  0x93   :  { %v87_v29 = vpop.f32.mrf.mxu1 }
  0x9e   :  { %v67_v28 = vpop.f32.mrf.mxu0 }
  0x9f   :  { %v68_v30 = vadd.f32 %v110_v27, %v67_v28 }
  0xa1   :  { %v88_v31 = vadd.f32 %v87_v29, %v68_v30 }
  0xa3   :  { %91 = vst.msk [vmem:[#allocation2] sm:$0xff] %vm90_vm1, %v88_v31 }
  0xa4   :  { %102 = dma.vmem_to_hbm [thread:$0]  %s98_s15, 128, %s100_s18, [#allocation3]  }
  0xa5   :  { %135 = dma.done.wait [#allocation3], 128  }
  0xa6   :  { %136 = vsyncadd [#allocation3], 4294967168 }
  0xa7   :  { %107 = vsyncpa [#allocation3], 1 }

</bundles_post_ra>
